<compile_context>
chip_gen: v6e
topology: v6e:2x2x1
jax: 0.10.0
libtpu: 0.0.40
codegen_flags: <defaults>
</compile_context>

<pallas_src>
import functools

import jax
import jax.numpy as jnp
from jax import lax
from jax.experimental import pallas as pl
from jax.experimental.pallas import tpu as pltpu


def _spatial_attention_kernel(x_ref, wq_ref, wk_ref, wv_ref, wout_ref,
                              bout_ref, gamma_ref, beta_ref, o_ref,
                              xn_ref, acc_ref, *, eps: float):
    # Grid: (batch b, head h).  x_ref block: (1, L, D); weight blocks are the
    # per-head slices (1, D, hd) / (1, hd, D); scratches persist across h.
    h = pl.program_id(1)
    last_h = pl.num_programs(1) - 1

    # ---- init (once per batch element): LayerNorm + residual/bias seed ----
    @pl.when(h == 0)
    def _init():
        x = x_ref[0].astype(jnp.float32)                       # (L, D) f32
        mean = jnp.mean(x, axis=-1, keepdims=True)
        centered = x - mean
        var = jnp.mean(centered * centered, axis=-1, keepdims=True)
        xn = centered * lax.rsqrt(var + eps)
        xn = xn * gamma_ref[...] + beta_ref[...]               # (L, D) f32
        xn_ref[...] = xn.astype(jnp.bfloat16)                  # cache for all heads
        # residual + out_proj bias, added exactly once
        acc_ref[...] = x + bout_ref[...]                       # (L, D) f32

    xn = xn_ref[...]                                           # (L, D) bf16

    # ---- per-head projections: bf16 MXU operands, f32 accumulation ----
    # softmax scale head_dim**-0.5 is already folded into wq in the wrapper.
    q = jnp.dot(xn, wq_ref[0], preferred_element_type=jnp.float32)   # (L, hd)
    k = jnp.dot(xn, wk_ref[0], preferred_element_type=jnp.float32)   # (L, hd)
    v = jnp.dot(xn, wv_ref[0], preferred_element_type=jnp.float32)   # (L, hd)

    # ---- scaled dot-product attention (softmax stats in f32) ----
    # q @ k^T without materializing a transpose (contract last dims).
    s = lax.dot_general(q.astype(jnp.bfloat16), k.astype(jnp.bfloat16),
                        dimension_numbers=(((1,), (1,)), ((), ())),
                        preferred_element_type=jnp.float32)            # (L, L)
    s = s - jnp.max(s, axis=-1, keepdims=True)
    p = jnp.exp(s)
    p = p * pl.reciprocal(jnp.sum(p, axis=-1, keepdims=True), approx=True)
    a = jnp.dot(p.astype(jnp.bfloat16), v.astype(jnp.bfloat16),
                preferred_element_type=jnp.float32)                    # (L, hd)

    # ---- accumulate this head's slice of the output projection ----
    acc_ref[...] += jnp.dot(a.astype(jnp.bfloat16), wout_ref[0],
                            preferred_element_type=jnp.float32)        # (L, D)

    # ---- finalize: write y = residual + out ----
    @pl.when(h == last_h)
    def _finalize():
        o_ref[0] = acc_ref[...].astype(o_ref.dtype)


def spatial_attention(x, w_qkv, w_out, b_out, gamma, beta,
                      *, num_heads: int, eps: float = 1e-5):
    """x: (B, L, D). w_qkv: (3D, D) PyTorch layout. w_out: (D, D). Returns (B, L, D)."""
    B, L, D = x.shape
    H = num_heads
    hd = D // H
    assert hd * H == D, "embed_dim must be divisible by num_heads"
    scale = hd ** (-0.5)

    w_qkv = jnp.asarray(w_qkv, jnp.float32)           # (3D, D)
    w_out = jnp.asarray(w_out, jnp.float32)           # (D, D)

    # Pre-split / pre-transpose per-head weights in the wrapper so the kernel
    # never slices a (L, 3D) buffer or concatenates heads.  bf16 cast halves
    # weight DMA + VMEM and feeds the MXU at full rate.
    def split_heads_in(w):                            # (D, D) -> (H, D, hd)
        return w.reshape(H, hd, D).transpose(0, 2, 1)

    wq_h = (split_heads_in(w_qkv[0 * D:1 * D]) * scale).astype(jnp.bfloat16)
    wk_h = split_heads_in(w_qkv[1 * D:2 * D]).astype(jnp.bfloat16)
    wv_h = split_heads_in(w_qkv[2 * D:3 * D]).astype(jnp.bfloat16)
    # out = concat_h(a_h) @ W_out^T + b  ==  sum_h a_h @ (W_out^T)[h*hd:(h+1)*hd, :] + b
    wo_h = w_out.T.reshape(H, hd, D).astype(jnp.bfloat16)      # (H, hd, D)

    b_out_r = jnp.asarray(b_out, jnp.float32).reshape(1, D)
    gamma_r = jnp.asarray(gamma, jnp.float32).reshape(1, D)
    beta_r = jnp.asarray(beta, jnp.float32).reshape(1, D)

    kernel = functools.partial(_spatial_attention_kernel, eps=eps)

    itemsize = jnp.dtype(x.dtype).itemsize
    flops = int(B * (8 * L * D * D + 4 * L * L * D))           # qkv + attn + out proj
    transcendentals = int(B * H * L * L)                       # softmax exp
    bytes_accessed = int(2 * B * L * D * itemsize              # x read + y write
                         + 4 * D * D * 2                       # bf16 weights
                         + 3 * D * 4)                          # bias / gamma / beta

    return pl.pallas_call(
        kernel,
        out_shape=jax.ShapeDtypeStruct((B, L, D), x.dtype),
        grid_spec=pltpu.PrefetchScalarGridSpec(
            num_scalar_prefetch=0,
            grid=(B, H),
            in_specs=[
                pl.BlockSpec((1, L, D), lambda b, h: (b, 0, 0)),   # x (per-batch)
                pl.BlockSpec((1, D, hd), lambda b, h: (h, 0, 0)),  # wq (per-head, scaled)
                pl.BlockSpec((1, D, hd), lambda b, h: (h, 0, 0)),  # wk (per-head)
                pl.BlockSpec((1, D, hd), lambda b, h: (h, 0, 0)),  # wv (per-head)
                pl.BlockSpec((1, hd, D), lambda b, h: (h, 0, 0)),  # w_out (per-head rows)
                pl.BlockSpec((1, D), lambda b, h: (0, 0)),         # b_out
                pl.BlockSpec((1, D), lambda b, h: (0, 0)),         # gamma
                pl.BlockSpec((1, D), lambda b, h: (0, 0)),         # beta
            ],
            out_specs=pl.BlockSpec((1, L, D), lambda b, h: (b, 0, 0)),
            scratch_shapes=[
                pltpu.VMEM((L, D), jnp.bfloat16),   # cached LayerNorm(x)
                pltpu.VMEM((L, D), jnp.float32),    # output accumulator
            ],
        ),
        compiler_params=pltpu.CompilerParams(
            dimension_semantics=("parallel", "arbitrary")),
        cost_estimate=pl.CostEstimate(flops=flops,
                                      transcendentals=transcendentals,
                                      bytes_accessed=bytes_accessed),
    )(x, wq_h, wk_h, wv_h, wo_h, b_out_r, gamma_r, beta_r)


def _reference(x, w_qkv, w_out, b_out, gamma, beta, *, num_heads, eps=1e-5):
    """Pure-JAX f32 reference mirroring the PyTorch module (eval mode)."""
    B, L, D = x.shape
    hd = D // num_heads
    mean = jnp.mean(x, axis=-1, keepdims=True)
    var = jnp.mean((x - mean) ** 2, axis=-1, keepdims=True)
    xn = (x - mean) / jnp.sqrt(var + eps) * gamma + beta
    qkv = xn @ w_qkv.T                                     # (B, L, 3D)
    qkv = qkv.reshape(B, L, 3, num_heads, hd).transpose(2, 0, 3, 1, 4)
    q, k, v = qkv[0], qkv[1], qkv[2]                       # (B, H, L, hd)
    scores = jnp.einsum('bhqd,bhkd->bhqk', q, k) * hd ** (-0.5)
    w = jax.nn.softmax(scores, axis=-1)
    attn = jnp.einsum('bhqk,bhkd->bhqd', w, v)             # (B, H, L, hd)
    attn = attn.transpose(0, 2, 1, 3).reshape(B, L, D)
    return x + (attn @ w_out.T + b_out)


if __name__ == "__main__":
    B, L, D, H = 2, 8, 32, 4

    key = jax.random.PRNGKey(0)
    kx, kqkv, kwo, kbo = jax.random.split(key, 4)

    x = jax.random.normal(kx, (B, L, D), dtype=jnp.float32)

    # Deterministic synthetic parameters (PyTorch-layout shapes).
    w_qkv = jax.random.normal(kqkv, (3 * D, D), dtype=jnp.float32) * (D ** -0.5)
    w_out = jax.random.normal(kwo, (D, D), dtype=jnp.float32) * (D ** -0.5)
    b_out = jax.random.normal(kbo, (D,), dtype=jnp.float32) * 0.02
    gamma = jnp.ones((D,), jnp.float32)
    beta = jnp.zeros((D,), jnp.float32)

    y = spatial_attention(x, w_qkv, w_out, b_out, gamma, beta, num_heads=H)
    y = jax.block_until_ready(y)

    y_ref = _reference(x, w_qkv, w_out, b_out, gamma, beta, num_heads=H)
    assert y.shape == (B, L, D)
    # bf16 MXU operands (f32 accumulation + f32 LN/softmax stats) -> loosened
    # tolerance vs the pure-f32 reference; structural bugs would be O(1) off.
    assert jnp.allclose(y, y_ref, atol=1e-1, rtol=1e-1), "mismatch vs reference"

    print("KERNEL_OK")
</pallas_src>

<mosaic_0001>
module attributes {stable_mosaic.version = 11 : i64} {
  func.func @_spatial_attention_kernel(%arg0: i32, %arg1: i32, %arg2: memref<1x8x32xf32, #tpu.memory_space<vmem>>, %arg3: memref<1x32x8xbf16, #tpu.memory_space<vmem>>, %arg4: memref<1x32x8xbf16, #tpu.memory_space<vmem>>, %arg5: memref<1x32x8xbf16, #tpu.memory_space<vmem>>, %arg6: memref<1x8x32xbf16, #tpu.memory_space<vmem>>, %arg7: memref<1x32xf32, #tpu.memory_space<vmem>>, %arg8: memref<1x32xf32, #tpu.memory_space<vmem>>, %arg9: memref<1x32xf32, #tpu.memory_space<vmem>>, %arg10: memref<1x8x32xf32, #tpu.memory_space<vmem>>, %arg11: memref<8x32xbf16, #tpu.memory_space<vmem>>, %arg12: memref<8x32xf32, #tpu.memory_space<vmem>>) attributes {dimension_semantics = [#tpu.dimension_semantics<parallel>, #tpu.dimension_semantics<arbitrary>], iteration_bounds = array<i64: 2, 4>, scalar_prefetch = 0 : i64, scratch_operands = 2 : i64, tpu.core_type = #tpu.core_type<tc>, window_params = [{transform_indices = @transform_0, window_bounds = array<i64: 1, 8, 32>}, {transform_indices = @transform_1, window_bounds = array<i64: 1, 32, 8>}, {transform_indices = @transform_2, window_bounds = array<i64: 1, 32, 8>}, {transform_indices = @transform_3, window_bounds = array<i64: 1, 32, 8>}, {transform_indices = @transform_4, window_bounds = array<i64: 1, 8, 32>}, {pipeline_mode = #tpu.pipeline_mode<synchronous>, transform_indices = @transform_5, window_bounds = array<i64: 1, 32>}, {pipeline_mode = #tpu.pipeline_mode<synchronous>, transform_indices = @transform_6, window_bounds = array<i64: 1, 32>}, {pipeline_mode = #tpu.pipeline_mode<synchronous>, transform_indices = @transform_7, window_bounds = array<i64: 1, 32>}, {transform_indices = @transform_8, window_bounds = array<i64: 1, 8, 32>}]} {
    %c0_i32 = arith.constant 0 : i32
    %0 = arith.cmpi eq, %arg1, %c0_i32 : i32
    %1 = arith.extui %0 : i1 to i32
    %c0_i32_0 = arith.constant 0 : i32
    %2 = arith.cmpi ne, %1, %c0_i32_0 : i32
    scf.if %2 {
      %c0_26 = arith.constant 0 : index
      %c0_27 = arith.constant 0 : index
      %c0_28 = arith.constant 0 : index
      %39 = vector.load %arg2[%c0_26, %c0_27, %c0_28] : memref<1x8x32xf32, #tpu.memory_space<vmem>>, vector<1x8x32xf32>
      %40 = vector.shape_cast %39 : vector<1x8x32xf32> to vector<8x32xf32>
      %cst_29 = arith.constant dense<0.000000e+00> : vector<8xf32>
      %41 = vector.multi_reduction <add>, %40, %cst_29 [1] : vector<8x32xf32> to vector<8xf32>
      %42 = vector.shape_cast %41 : vector<8xf32> to vector<8x1xf32>
      %cst_30 = arith.constant 3.200000e+01 : f32
      %43 = vector.broadcast %cst_30 : f32 to vector<8x1xf32>
      %44 = arith.divf %42, %43 : vector<8x1xf32>
      %45 = vector.broadcast %44 : vector<8x1xf32> to vector<8x32xf32>
      %46 = arith.subf %40, %45 : vector<8x32xf32>
      %47 = arith.mulf %46, %46 : vector<8x32xf32>
      %cst_31 = arith.constant dense<0.000000e+00> : vector<8xf32>
      %48 = vector.multi_reduction <add>, %47, %cst_31 [1] : vector<8x32xf32> to vector<8xf32>
      %49 = vector.shape_cast %48 : vector<8xf32> to vector<8x1xf32>
      %cst_32 = arith.constant 3.200000e+01 : f32
      %50 = vector.broadcast %cst_32 : f32 to vector<8x1xf32>
      %51 = arith.divf %49, %50 : vector<8x1xf32>
      %cst_33 = arith.constant 9.99999974E-6 : f32
      %52 = vector.broadcast %cst_33 : f32 to vector<8x1xf32>
      %53 = arith.addf %51, %52 : vector<8x1xf32>
      %54 = math.rsqrt %53 : vector<8x1xf32>
      %55 = vector.broadcast %54 : vector<8x1xf32> to vector<8x32xf32>
      %56 = arith.mulf %46, %55 : vector<8x32xf32>
      %c0_34 = arith.constant 0 : index
      %c0_35 = arith.constant 0 : index
      %57 = vector.load %arg8[%c0_34, %c0_35] : memref<1x32xf32, #tpu.memory_space<vmem>>, vector<1x32xf32>
      %58 = vector.broadcast %57 : vector<1x32xf32> to vector<8x32xf32>
      %59 = arith.mulf %56, %58 : vector<8x32xf32>
      %c0_36 = arith.constant 0 : index
      %c0_37 = arith.constant 0 : index
      %60 = vector.load %arg9[%c0_36, %c0_37] : memref<1x32xf32, #tpu.memory_space<vmem>>, vector<1x32xf32>
      %61 = vector.broadcast %60 : vector<1x32xf32> to vector<8x32xf32>
      %62 = arith.addf %59, %61 : vector<8x32xf32>
      %63 = arith.truncf %62 : vector<8x32xf32> to vector<8x32xbf16>
      %c0_38 = arith.constant 0 : index
      %c0_39 = arith.constant 0 : index
      %64 = vector.load %arg11[%c0_38, %c0_39] : memref<8x32xbf16, #tpu.memory_space<vmem>>, vector<8x32xbf16>
      tpu.vector_store %arg11[%c0_38, %c0_39], %63 {strides = array<i32>} : memref<8x32xbf16, #tpu.memory_space<vmem>>, vector<8x32xbf16>,
      %c0_40 = arith.constant 0 : index
      %c0_41 = arith.constant 0 : index
      %65 = vector.load %arg7[%c0_40, %c0_41] : memref<1x32xf32, #tpu.memory_space<vmem>>, vector<1x32xf32>
      %66 = vector.broadcast %65 : vector<1x32xf32> to vector<8x32xf32>
      %67 = arith.addf %40, %66 : vector<8x32xf32>
      %c0_42 = arith.constant 0 : index
      %c0_43 = arith.constant 0 : index
      %68 = vector.load %arg12[%c0_42, %c0_43] : memref<8x32xf32, #tpu.memory_space<vmem>>, vector<8x32xf32>
      tpu.vector_store %arg12[%c0_42, %c0_43], %67 {strides = array<i32>} : memref<8x32xf32, #tpu.memory_space<vmem>>, vector<8x32xf32>,
    } else {
    }
    %c0 = arith.constant 0 : index
    %c0_1 = arith.constant 0 : index
    %3 = vector.load %arg11[%c0, %c0_1] : memref<8x32xbf16, #tpu.memory_space<vmem>>, vector<8x32xbf16>
    %c0_2 = arith.constant 0 : index
    %c0_3 = arith.constant 0 : index
    %c0_4 = arith.constant 0 : index
    %4 = vector.load %arg3[%c0_2, %c0_3, %c0_4] : memref<1x32x8xbf16, #tpu.memory_space<vmem>>, vector<1x32x8xbf16>
    %5 = vector.shape_cast %4 : vector<1x32x8xbf16> to vector<32x8xbf16>
    %cst = arith.constant dense<0.000000e+00> : vector<8x8xf32>
    %6 = tpu.matmul %3, %5, %cst {dimension_numbers = #tpu.dot_dimension_numbers<[1], [0], [0], [1], [0, 0, 1, 1], [], []>} : vector<8x32xbf16>, vector<32x8xbf16>, vector<8x8xf32> -> vector<8x8xf32>
    %c0_5 = arith.constant 0 : index
    %c0_6 = arith.constant 0 : index
    %c0_7 = arith.constant 0 : index
    %7 = vector.load %arg4[%c0_5, %c0_6, %c0_7] : memref<1x32x8xbf16, #tpu.memory_space<vmem>>, vector<1x32x8xbf16>
    %8 = vector.shape_cast %7 : vector<1x32x8xbf16> to vector<32x8xbf16>
    %cst_8 = arith.constant dense<0.000000e+00> : vector<8x8xf32>
    %9 = tpu.matmul %3, %8, %cst_8 {dimension_numbers = #tpu.dot_dimension_numbers<[1], [0], [0], [1], [0, 0, 1, 1], [], []>} : vector<8x32xbf16>, vector<32x8xbf16>, vector<8x8xf32> -> vector<8x8xf32>
    %c0_9 = arith.constant 0 : index
    %c0_10 = arith.constant 0 : index
    %c0_11 = arith.constant 0 : index
    %10 = vector.load %arg5[%c0_9, %c0_10, %c0_11] : memref<1x32x8xbf16, #tpu.memory_space<vmem>>, vector<1x32x8xbf16>
    %11 = vector.shape_cast %10 : vector<1x32x8xbf16> to vector<32x8xbf16>
    %cst_12 = arith.constant dense<0.000000e+00> : vector<8x8xf32>
    %12 = tpu.matmul %3, %11, %cst_12 {dimension_numbers = #tpu.dot_dimension_numbers<[1], [0], [0], [1], [0, 0, 1, 1], [], []>} : vector<8x32xbf16>, vector<32x8xbf16>, vector<8x8xf32> -> vector<8x8xf32>
    %13 = arith.truncf %6 : vector<8x8xf32> to vector<8x8xbf16>
    %14 = arith.truncf %9 : vector<8x8xf32> to vector<8x8xbf16>
    %cst_13 = arith.constant dense<0.000000e+00> : vector<8x8xf32>
    %15 = tpu.matmul %13, %14, %cst_13 {dimension_numbers = #tpu.dot_dimension_numbers<[1], [1], [0], [0], [0, 0, 1, 0], [], []>} : vector<8x8xbf16>, vector<8x8xbf16>, vector<8x8xf32> -> vector<8x8xf32>
    %cst_14 = arith.constant dense<0xFF800000> : vector<8xf32>
    %16 = vector.multi_reduction <maximumf>, %15, %cst_14 [1] : vector<8x8xf32> to vector<8xf32>
    %17 = vector.shape_cast %16 : vector<8xf32> to vector<8x1xf32>
    %18 = vector.broadcast %17 : vector<8x1xf32> to vector<8x8xf32>
    %19 = arith.subf %15, %18 : vector<8x8xf32>
    %20 = math.exp %19 : vector<8x8xf32>
    %cst_15 = arith.constant dense<0.000000e+00> : vector<8xf32>
    %21 = vector.multi_reduction <add>, %20, %cst_15 [1] : vector<8x8xf32> to vector<8xf32>
    %22 = vector.shape_cast %21 : vector<8xf32> to vector<8x1xf32>
    %23 = tpu.reciprocal %22 {approx = true} : vector<8x1xf32> -> vector<8x1xf32>
    %24 = vector.broadcast %23 : vector<8x1xf32> to vector<8x8xf32>
    %25 = arith.mulf %20, %24 : vector<8x8xf32>
    %26 = arith.truncf %25 : vector<8x8xf32> to vector<8x8xbf16>
    %27 = arith.truncf %12 : vector<8x8xf32> to vector<8x8xbf16>
    %cst_16 = arith.constant dense<0.000000e+00> : vector<8x8xf32>
    %28 = tpu.matmul %26, %27, %cst_16 {dimension_numbers = #tpu.dot_dimension_numbers<[1], [0], [0], [1], [0, 0, 1, 1], [], []>} : vector<8x8xbf16>, vector<8x8xbf16>, vector<8x8xf32> -> vector<8x8xf32>
    %c0_17 = arith.constant 0 : index
    %c0_18 = arith.constant 0 : index
    %29 = vector.load %arg12[%c0_17, %c0_18] : memref<8x32xf32, #tpu.memory_space<vmem>>, vector<8x32xf32>
    %30 = arith.truncf %28 : vector<8x8xf32> to vector<8x8xbf16>
    %c0_19 = arith.constant 0 : index
    %c0_20 = arith.constant 0 : index
    %c0_21 = arith.constant 0 : index
    %31 = vector.load %arg6[%c0_19, %c0_20, %c0_21] : memref<1x8x32xbf16, #tpu.memory_space<vmem>>, vector<1x8x32xbf16>
    %32 = vector.shape_cast %31 : vector<1x8x32xbf16> to vector<8x32xbf16>
    %cst_22 = arith.constant dense<0.000000e+00> : vector<8x32xf32>
    %33 = tpu.matmul %30, %32, %cst_22 {dimension_numbers = #tpu.dot_dimension_numbers<[1], [0], [0], [1], [0, 0, 1, 1], [], []>} : vector<8x8xbf16>, vector<8x32xbf16>, vector<8x32xf32> -> vector<8x32xf32>
    %34 = arith.addf %29, %33 : vector<8x32xf32>
    %c0_23 = arith.constant 0 : index
    %c0_24 = arith.constant 0 : index
    %35 = vector.load %arg12[%c0_23, %c0_24] : memref<8x32xf32, #tpu.memory_space<vmem>>, vector<8x32xf32>
    tpu.vector_store %arg12[%c0_23, %c0_24], %34 {strides = array<i32>} : memref<8x32xf32, #tpu.memory_space<vmem>>, vector<8x32xf32>,
    %c3_i32 = arith.constant 3 : i32
    %36 = arith.cmpi eq, %arg1, %c3_i32 : i32
    %37 = arith.extui %36 : i1 to i32
    %c0_i32_25 = arith.constant 0 : i32
    %38 = arith.cmpi ne, %37, %c0_i32_25 : i32
    scf.if %38 {
      %c0_26 = arith.constant 0 : index
      %c0_27 = arith.constant 0 : index
      %39 = vector.load %arg12[%c0_26, %c0_27] : memref<8x32xf32, #tpu.memory_space<vmem>>, vector<8x32xf32>
      %c0_28 = arith.constant 0 : index
      %c0_29 = arith.constant 0 : index
      %c0_30 = arith.constant 0 : index
      %40 = vector.load %arg10[%c0_28, %c0_29, %c0_30] : memref<1x8x32xf32, #tpu.memory_space<vmem>>, vector<1x8x32xf32>
      %41 = vector.shape_cast %40 : vector<1x8x32xf32> to vector<8x32xf32>
      %42 = vector.shape_cast %39 : vector<8x32xf32> to vector<1x8x32xf32>
      tpu.vector_store %arg10[%c0_28, %c0_29, %c0_30], %42 {strides = array<i32>} : memref<1x8x32xf32, #tpu.memory_space<vmem>>, vector<1x8x32xf32>,
    } else {
    }
    return
  }
  func.func @transform_0(%arg0: i32, %arg1: i32) -> (i32, i32, i32) {
    %c0_i32 = arith.constant 0 : i32
    %c0_i32_0 = arith.constant 0 : i32
    %c0_i32_1 = arith.constant 0 : i32
    return %arg0, %c0_i32, %c0_i32_0 : i32, i32, i32
  }
  func.func @transform_1(%arg0: i32, %arg1: i32) -> (i32, i32, i32) {
    %c0_i32 = arith.constant 0 : i32
    %c0_i32_0 = arith.constant 0 : i32
    %c0_i32_1 = arith.constant 0 : i32
    return %arg1, %c0_i32, %c0_i32_0 : i32, i32, i32
  }
  func.func @transform_2(%arg0: i32, %arg1: i32) -> (i32, i32, i32) {
    %c0_i32 = arith.constant 0 : i32
    %c0_i32_0 = arith.constant 0 : i32
    %c0_i32_1 = arith.constant 0 : i32
    return %arg1, %c0_i32, %c0_i32_0 : i32, i32, i32
  }
  func.func @transform_3(%arg0: i32, %arg1: i32) -> (i32, i32, i32) {
    %c0_i32 = arith.constant 0 : i32
    %c0_i32_0 = arith.constant 0 : i32
    %c0_i32_1 = arith.constant 0 : i32
    return %arg1, %c0_i32, %c0_i32_0 : i32, i32, i32
  }
  func.func @transform_4(%arg0: i32, %arg1: i32) -> (i32, i32, i32) {
    %c0_i32 = arith.constant 0 : i32
    %c0_i32_0 = arith.constant 0 : i32
    %c0_i32_1 = arith.constant 0 : i32
    return %arg1, %c0_i32, %c0_i32_0 : i32, i32, i32
  }
  func.func @transform_5(%arg0: i32, %arg1: i32) -> (i32, i32) {
    %c0_i32 = arith.constant 0 : i32
    %c0_i32_0 = arith.constant 0 : i32
    %c0_i32_1 = arith.constant 0 : i32
    return %c0_i32, %c0_i32_0 : i32, i32
  }
  func.func @transform_6(%arg0: i32, %arg1: i32) -> (i32, i32) {
    %c0_i32 = arith.constant 0 : i32
    %c0_i32_0 = arith.constant 0 : i32
    %c0_i32_1 = arith.constant 0 : i32
    return %c0_i32, %c0_i32_0 : i32, i32
  }
  func.func @transform_7(%arg0: i32, %arg1: i32) -> (i32, i32) {
    %c0_i32 = arith.constant 0 : i32
    %c0_i32_0 = arith.constant 0 : i32
    %c0_i32_1 = arith.constant 0 : i32
    return %c0_i32, %c0_i32_0 : i32, i32
  }
  func.func @transform_8(%arg0: i32, %arg1: i32) -> (i32, i32, i32) {
    %c0_i32 = arith.constant 0 : i32
    %c0_i32_0 = arith.constant 0 : i32
    %c0_i32_1 = arith.constant 0 : i32
    return %arg0, %c0_i32, %c0_i32_0 : i32, i32, i32
  }
}

</mosaic_0001>

<bundles_post_ra>
// kernel: tpu_custom_call.1
= control target key start
LH: loop header
LB: loop body
LE: loop exit
PB: predicated region body
PF: predicated region fallthrough
CT: control target
= control target key end

     0   :  { %13 = vsyncpa [#allocation5], 0  ;;  %s1419_s0 = inlined_call_operand.vmem [shape: f32[2,8,32], index: 0, kind: input, shape index: {}]   ;;  %s1420_s1 = inlined_call_operand.vmem [shape: bf16[4,32,8], index: 1, kind: input, shape index: {}]   ;;  %s1421_s2 = inlined_call_operand.vmem [shape: bf16[4,32,8], index: 2, kind: input, shape index: {}]   ;;  %s1422_s3 = inlined_call_operand.vmem [shape: bf16[4,32,8], index: 3, kind: input, shape index: {}]   ;;  %s1423_s4 = inlined_call_operand.vmem [shape: bf16[4,8,32], index: 4, kind: input, shape index: {}]   ;;  %s1424_s5 = inlined_call_operand.vmem [shape: f32[1,32], index: 5, kind: input, shape index: {}]   ;;  %s1425_s6 = inlined_call_operand.vmem [shape: f32[1,32], index: 6, kind: input, shape index: {}]   ;;  %s1426_s7 = inlined_call_operand.vmem [shape: f32[1,32], index: 7, kind: input, shape index: {}]   ;;  %s1427_s8 = inlined_call_operand.hbm [shape: f32[2,8,32], index: 8, kind: output, shape index: {}]  }
   0x1   :  { %15 = vsyncpa [#allocation5 + $0x1], 0  ;;  %s1232_s27 = smov 0   ;;  %s1234_s28 = smov 0  }
   0x2   :  { %s1236_s29 = smov 0   ;;  %s1238_s30 = smov 0  }
   0x3   :  { %s1240_s9 = smov 0   ;;  %s1242_s10 = smov 0  }
   0x4   :  { %s1244_s11 = smov 0   ;;  %s1246_s12 = smov 0  }
   0x5 LB: > { %1437 = sst [smem:[#allocation7_spill]] %s1154_s27  ;;  %s910_s13 = sadd.s32 4294967295, %s1182_s12   ;;  %s1182_s12 = sphi %s1246_s12, %s21_s12   ;;  %s1178_s11 = sphi %s1244_s11, %s1457_s11   ;;  %s1174_s10 = sphi %s1242_s10, %s1456_s10   ;;  %s1170_s9 = sphi %s1240_s9, %s1455_s9   ;;  %s1166_s30 = sphi %s1238_s30, %s1454_s30   ;;  %s1162_s29 = sphi %s1236_s29, %s1453_s29   ;;  %s1158_s28 = sphi %s1234_s28, %s1459_s28   ;;  %s1154_s27 = sphi %s1232_s27, %s1458_s27  }
   0x6   : > { %1438 = sst [smem:[#allocation8_spill]] %s1162_s29  ;;  %s911_s14 = sadd.s32 4294967294, %s1182_s12  }
   0x7   : > { %1439 = sst [smem:[#allocation9_spill]] %s1174_s10  ;;  %s30_s15 = sadd.s32 1, %s1174_s10 }
   0x8   : > { %1440 = sst [smem:[#allocation10_spill]] %s1178_s11  ;;  %p31_p0 = scmp.ge.s32.totalorder %s30_s15, 4 }
   0x9   : > { %1441 = sst [smem:[#allocation11_spill]] %s1182_s12  ;;  %s33_s16 = sadd.s32 1, %s1178_s11 }
   0xa   : > { %p243_p1 = scmp.ne.s32.totalorder %s1162_s29, %s1158_s28  ;;  %p244_p2 = scmp.eq.s32.totalorder %s910_s13, 7 }
   0xb   : > { %s1461_s15 = smov (%p31_p0, %s30_s15), 0  ;;  %s1463_s16 = smov (!%p31_p0, %s33_s16), %s1178_s11 }
   0xc   : > { %1442 = sst [smem:[#allocation12_spill]] %s1461_s15  ;;  %p1281_p3 = por %p244_p2, %p243_p1 }
   0xd   : > { %p249_p4 = scmp.ne.s32.totalorder %s1158_s28, %s1154_s27  ;;  %p35_p5 = scmp.ge.s32.totalorder %s1463_s16, 2 }
   0xe   : > { %p250_p6 = scmp.eq.s32.totalorder %s911_s14, 7  ;;  %p914_p7 = scmp.ge.s32.totalorder %s1182_s12, 1 }
   0xf   : > { %p315_p8 = scmp.lt.s32.totalorder %s1182_s12, 9  ;;  %s1465_s16 = smov (%p35_p5, %s1463_s16), 0 }
  0x10   : > { %1444 = sst [smem:[#allocation13_spill]] %s1465_s16  ;;  %p1291_p9 = por %p250_p6, %p249_p4 }
  0x11   : > { %p316_p10 = pnand %p914_p7, %p315_p8  ;;  %s230_s19 = ssub.s32 %s1178_s11, %s1465_s16 }
  0x12   : > { %s1445_s18 = scalar_select %p1291_p9, 1, 0 }
  0x13   : > { %s233_s20 = sadd.s32 1, %s1162_s29  ;;  %p231_p11 = scmp.eq.s32.totalorder %s230_s19, 0 }
  0x14   : > { %1446 = sst [smem:[#allocation14_spill]] %s1445_s18  ;;  %319 = sbr.rel (%p316_p10) target bundleno = 1490 (0x5d2), region = 52 }
  0x15   : > { %s1299_s21 = scalar_select %p231_p11, %s1162_s29, %s233_s20  }
  0x16   : > { %s1431_s22 = sand.u32 (!%p316_p10), 1, %s1158_s28   ;;  %p367_p12 = scmp.lt.s32.totalorder (!%p316_p10), %s1170_s9, 1 }
  0x17   : > { %1447 = sst [smem:[#allocation15_spill]] %s1299_s21  ;;  %s1305_s23 = sshll.u32 (!%p316_p10), %s1431_s22, 3 }
  0x18   : > { %p371_p13 = scmp.lt.s32.totalorder (!%p316_p10), %s1166_s30, 3  ;;  %s366_s14 = scalar_lea.vmem (!%p316_p10), [#allocation4], %s1305_s23 }
  0x19   : > { %s368_s24 = scalar_select %p367_p12, %s1170_s9, 1 }
  0x1a   : > { %s372_s25 = scalar_select %p371_p13, %s1166_s30, 3 }
  0x1b   : > { %s916_s26 = sshll.u32 %s368_s24, 3  ;;  %p924_p0 = scmp.ne.s32.totalorder %s1166_s30, 0 }
  0x1c   : > { %s370_s19 = scalar_lea.vmem %s1419_s0, %s916_s26  ;;  %s945_s20 = sshll.u32 %s372_s25, 4 }
  0x1d   : > { %s1316_s11 = scalar_lea.vmem %s1420_s1, %s945_s20  ;;  %s1321_s22 = scalar_lea.vmem %s1421_s2, %s945_s20 }
  0x1e   : > { %s1326_s27 = scalar_lea.vmem %s1422_s3, %s945_s20  ;;  %s923_s24 = sshll.u32 %s372_s25, 2 }
  0x1f   : > { %s1331_s26 = scalar_lea.vmem %s1423_s4, %s923_s24  ;;  %394 = sbr.rel (%p924_p0) target bundleno = 348 (0x15c), region = 56 }
  0x24   : > { %v395_v0 = vld [vmem:[%s370_s19] sm:$0xff]  ;;  %vm396_vm0 = vcmask 261120   ;;  %vm428_vm1 = vcmask 257024  }
  0x25   : > { %v927_v1 = vld [vmem:[%s1424_s5] ss:$0 sm:$0xff]  ;;  %v397_v2 = vsel %vm396_vm0, %v395_v0, 0.0 }
  0x26   : > { %v437_v3 = vadd.f32 %v927_v1, %v395_v0  ;;  %398 = vadd.xlane.f32.xlu0 %v397_v2  ;;  %v925_v13 = vld [vmem:[%s1425_s6] ss:$0 sm:$0xff] }
  0x27   : > { %v926_v15 = vld [vmem:[%s1426_s7] ss:$0 sm:$0xff] }
  0x28   : > { %438 = vst.msk [vmem:[#allocation3] sm:$0xff] %vm396_vm0, %v437_v3 }
  0xaf   : > { %v399_v4 = vpop.xlane.xlu0 %398 }
  0xb0   : > { %v401_v5 = vmul.f32 0.03125, %v399_v4 }
  0xb2   : > { %v402_v6 = vsub.f32 %v395_v0, %v401_v5 }
  0xb4   : > { %v403_v7 = vmul.f32 %v402_v6, %v402_v6 }
  0xb6   : > { %v404_v8 = vsel %vm396_vm0, %v403_v7, 0.0 }
  0xb7   : > { %405 = vadd.xlane.f32.xlu0 %v404_v8 }
 0x140   : > { %v406_v9 = vpop.xlane.xlu0 %405 }
 0x141   : > { %v407_v10 = vmul.f32 0.03125, %v406_v9 }
 0x143   : > { %v408_v11 = vadd.f32 1e-05, %v407_v10 }
 0x145   : > { %1078 = vrsqrt.f32 %v408_v11 }
 0x152   : > { %v1079_v12 = vpop.eup %1078 }
 0x153   : > { %v410_v14 = vmul.f32 %v1079_v12, %v402_v6 }
 0x155   : > { %v418_v16 = vmul.f32 %v925_v13, %v410_v14 }
 0x157   : > { %v426_v17 = vadd.f32 %v926_v15, %v418_v16 }
 0x159   : > { %v427_v18 = vpack.c.bf16 %v426_v17, %v426_v17 }
 0x15b   : > { %429 = vst.msk [vmem:[#allocation2] sm:$0xf] %vm428_vm1, %v427_v18 }
 0x15c PF: > { %v1080_v19 = vld [vmem:[%s1321_s22 + $0x8] sm:$0xff]   ;;  %v1184_v20 = vmov 0.0   ;;  %v1082_v22 = vld [vmem:[%s1321_s22] sm:$0xff]   ;;  %vm1185_vm2 = vmmov 0   ;;  %vm456_vm3 = vcmask 261120   ;;  %vm614_vm4 = vcmask 64512  }
 0x15d   : > { %971 = vmatprep.subr.bf16.mxu1 %v1184_v20  ;;  %963 = vmatprep.subr.bf16.mxu0 %v1184_v20  ;;  %v1081_v21 = vld [vmem:[%s1316_s11 + $0x8] sm:$0xff]   ;;  %v1083_v23 = vld [vmem:[%s1316_s11] sm:$0xff]   ;;  %vm677_vm5 = vcmask 1043456   ;;  %p940_p1 = scmp.ne.s32.totalorder %s1166_s30, 3 }
 0x15e   : > { %972 = vmatpush3.bf16.msra.mxu1 %v1080_v19  ;;  %975 = vmatprep.mubr.msk.bf16.mxu1 %vm1185_vm2, %v1184_v20  ;;  %v1084_v36 = vld [vmem:[%s1326_s27 + $0x8] sm:$0xff]   ;;  %v1085_v37 = vld [vmem:[%s1326_s27] sm:$0xff]  }
 0x15f   : > { %964 = vmatpush3.bf16.msra.mxu0 %v1081_v21  ;;  %973 = vmatprep.subr.bf16.mxu1 %v1184_v20  ;;  %v723_v54 = vld [vmem:[%s1331_s26] sm:$0xf]  ;;  %v721_v1 = vld [vmem:[#allocation3] sm:$0xff] }
 0x160   : > { %965 = vmatprep.subr.bf16.mxu0 %v1184_v20  ;;  %967 = vmatprep.mubr.msk.bf16.mxu0 %vm1185_vm2, %v1184_v20  ;;  %v728_v55 = vsel %vm677_vm5, %v723_v54, 0 }
 0x162   : > { %974 = vmatpush3.bf16.msra.mxu1 %v1082_v22  ;;  %v439_v24 = vld [vmem:[#allocation2] sm:$0xf] }
 0x163   : > { %966 = vmatpush3.bf16.msra.mxu0 %v1083_v23  ;;  %987 = vmatprep.subr.bf16.mxu1 %v1184_v20 }
 0x164   : > { %979 = vmatprep.subr.bf16.mxu0 %v1184_v20 }
 0x165   : > { %976 = vmatmul.mubr.msk.bf16.vlgmr.msra.gmra.mxu1 %vm456_vm3, %v439_v24 }
 0x166   : > { %968 = vmatmul.mubr.msk.bf16.vlgmr.msra.gmra.mxu0 %vm456_vm3, %v439_v24  ;;  %989 = vmatprep.mubr.msk.bf16.mxu1 %vm1185_vm2, %v1184_v20 }
 0x167   : > { %983 = vmatprep.mubr.msk.bf16.mxu0 %vm1185_vm2, %v1184_v20  ;;  %980 = vmatpush3.bf16.msra.mxu0 %v1084_v36 }
 0x168   : > { %981 = vmatprep.subr.bf16.mxu0 %v1184_v20 }
 0x16b   : > { %982 = vmatpush3.bf16.msra.mxu0 %v1085_v37 }
 0x16c   : > { %993 = vmatprep.subr.bf16.mxu0 %v1184_v20 }
 0x16e   : > { %984 = vmatmul.mubr.msk.bf16.vlgmr.msra.gmra.mxu0 %vm456_vm3, %v439_v24 }
 0x16f   : > { %995 = vmatprep.mubr.msk.bf16.mxu0 %vm1185_vm2, %v1184_v20 }
 0x225   : > { %v550_v25 = vpop.f32.mrf.mxu1 }
 0x226   : > { %v613_v26 = vpack.c.bf16 %v550_v25, %v550_v25  ;;  %v494_v27 = vpop.f32.mrf.mxu0 }
 0x227   : > { %v977_v28 = vpop.f32.mrf.mxu1  ;;  %v612_v34 = vpack.c.bf16 %v494_v27, %v494_v27 }
 0x228   : > { %v619_v29 = vsel %vm614_vm4, %v613_v26, 0  ;;  %v969_v30 = vpop.f32.mrf.mxu0 }
 0x229   : > { %v553_v31 = vpop.f32.mrf.mxu1  ;;  %988 = vmatpush3.bf16.xpose.msra.mxu1 %v619_v29 }
 0x22a   : > { %v497_v32 = vpop.f32.mrf.mxu0  ;;  %999 = vmatprep.subr.bf16.mxu1 %v1184_v20 }
 0x22b   : > { %v978_v33 = vpop.f32.mrf.mxu1 }
 0x22c   : > { %v970_v35 = vpop.f32.mrf.mxu0 }
 0x22e   : > { %v606_v48 = vpop.f32.mrf.mxu0 }
 0x22f   : > { %v673_v49 = vpack.c.bf16 %v606_v48, %v606_v48 }
 0x230   : > { %990 = vmatmul.mubr.msk.bf16.vlgmr.msra.gmra.mxu1 %vm614_vm4, %v612_v34  ;;  %v985_v50 = vpop.f32.mrf.mxu0 }
 0x231   : > { %1001 = vmatprep.mubr.msk.bf16.mxu1 %vm1185_vm2, %v1184_v20  ;;  %v679_v51 = vsel %vm677_vm5, %v673_v49, 0  ;;  %1000 = vmatpush3.bf16.msra.mxu1 %v728_v55 }
 0x232   : > { %v609_v52 = vpop.f32.mrf.mxu0  ;;  %994 = vmatpush3.bf16.msra.mxu0 %v679_v51 }
 0x234   : > { %v986_v53 = vpop.f32.mrf.mxu0 }
 0x2f0   : > { %v655_v38 = vpop.f32.mrf.mxu1 }
 0x2f1   : > { %v661_v39 = vsel %vm614_vm4, %v655_v38, -inf }
 0x2f2   : > { %662 = vmax.xlane.f32.xlu0 %v661_v39  ;;  %v991_v40 = vpop.f32.mrf.mxu1 }
 0x2f4   : > { %v658_v41 = vpop.f32.mrf.mxu1 }
 0x2f6   : > { %v992_v42 = vpop.f32.mrf.mxu1 }
 0x37b   : > { %v663_v43 = vpop.xlane.xlu0 %662 }
 0x37c   : > { %v664_v44 = vsub.f32 %v655_v38, %v663_v43 }
 0x37e   : > { %v665_v45 = vmul.f32 1.442695, %v664_v44 }
 0x380   : > { %1086 = vpow2.f32 %v665_v45 }
 0x38d   : > { %v1087_v46 = vpop.eup %1086 }
 0x38e   : > { %v667_v47 = vsel %vm614_vm4, %v1087_v46, 0.0 }
 0x38f   : > { %668 = vadd.xlane.f32.xlu0 %v667_v47 }
 0x418   : > { %v669_v56 = vpop.xlane.xlu0 %668 }
 0x419   : > { %1088 = vrcp.f32 %v669_v56 }
 0x426   : > { %v1089_v57 = vpop.eup %1088 }
 0x427   : > { %v671_v58 = vmul.f32 %v1089_v57, %v1087_v46 }
 0x429   : > { %v672_v59 = vpack.c.bf16 %v671_v58, %v671_v58 }
 0x42b   : > { %996 = vmatmul.mubr.msk.bf16.vlgmr.msra.gmra.mxu0 %vm614_vm4, %v672_v59 }
 0x4eb   : > { %v715_v60 = vpop.f32.mrf.mxu0 }
 0x4ec   : > { %v722_v61 = vpack.c.bf16 %v715_v60, %v715_v60 }
 0x4ed   : > { %v997_v62 = vpop.f32.mrf.mxu0 }
 0x4ee   : > { %1002 = vmatmul.mubr.msk.bf16.vlgmr.msra.gmra.mxu1 %vm614_vm4, %v722_v61 }
 0x4ef   : > { %v718_v63 = vpop.f32.mrf.mxu0 }
 0x4f1   : > { %v998_v0 = vpop.f32.mrf.mxu0 }
 0x5ae   : > { %v764_v2 = vpop.f32.mrf.mxu1 }
 0x5af   : > { %v770_v3 = vadd.f32 %v764_v2, %v721_v1 }
 0x5b0   : > { %v1003_v4 = vpop.f32.mrf.mxu1  ;;  %775 = sbr.rel (%p940_p1) target bundleno = 1466 (0x5ba), region = 60 }
 0x5b1   : > { %771 = vst.msk [vmem:[#allocation3] sm:$0xff] %vm456_vm3, %v770_v3 }
 0x5b2   : > { %v767_v5 = vpop.f32.mrf.mxu1 }
 0x5b4   : > { %v1004_v6 = vpop.f32.mrf.mxu1 }
 0x5b8   : > { %v776_v7 = vld [vmem:[#allocation3] sm:$0xff] }
 0x5b9   : > { %777 = vst.msk [vmem:[%s366_s14] sm:$0xff] %vm456_vm3, %v776_v7 }
 0x5ba PF: > { %s942_s27 = sshll.u32 %s1170_s9, 7  ;;  %s792_s25 = sshll.u32 %s366_s14, 4  ;;  %s793_s25 = int_to_ptr.vmem [resolvable:$true] %s792_s25 }
 0x5bb   : > { %s790_s22 = scalar_lea.hbm %s1427_s8, %s942_s27  ;;  %s1448_s30 = sand.u32 1, %s1158_s28  }
 0x5bc   : > { %s779_s19 = scalar_lea.sflag [#allocation5], %s1448_s30  ;;  %s1090_s20 = scalar_lea.vmem %s793_s25, 128 }
 0x5bd   : > { %p1091_p2 = scmp.ne.s32.totalorder %s793_s25, %s1090_s20  ;;  %s1186_s24 = smov [#allocation4]  }
 0x5be   : > { %s1094_s13 = sshll.u32 %s1186_s24, 4  ;;  %s1095_s13 = int_to_ptr.vmem [resolvable:$false] %s1094_s13 }
 0x5bf   : > { %p1092_p4 = pnand %p1091_p2, %p1281_p3  ;;  %s1096_s26 = scalar_lea.vmem %s1095_s13, 256 }
 0x5c0   : > { %p1097_p6 = scmp.lt.s32.totalorder %s793_s25, %s1095_s13  ;;  %p1098_p7 = scmp.lt.s32.totalorder %s1096_s26, %s1090_s20 }
 0x5c1   : > { %p1093_p5 = pneg %p1092_p4 }
 0x5c2   : > { %p1099_p8 = por %p1098_p7, %p1097_p6 }
 0x5c4   : > { %p1100_p10 = pnand %p1099_p8, %p1093_p5 }
 0x5c6   : > { %1103 = shalt.err (!%p1100_p10)
}
 0x5c7   : > { %s1104_s9 = scalar_lea.hbm %s790_s22, 128  ;;  %s1108_s10 = scalar_lea.hbm %s1427_s8, 256 }
 0x5c8   : > { %p1105_p11 = scmp.ne.s32.totalorder %s790_s22, %s1104_s9  ;;  %p1109_p0 = scmp.lt.s32.totalorder %s790_s22, %s1427_s8 }
 0x5c9   : > { %p1110_p1 = scmp.lt.s32.totalorder %s1108_s10, %s1104_s9 }
 0x5ca   : > { %p1106_p12 = pnand %p1105_p11, %p1281_p3 }
 0x5cb   : > { %p1111_p2 = por %p1110_p1, %p1109_p0 }
 0x5cc   : > { %p1107_p13 = pneg %p1106_p12 }
 0x5ce   : > { %p1112_p4 = pnand %p1111_p2, %p1107_p13 }
 0x5d0   : > { %1115 = shalt.err (!%p1112_p4)
}
 0x5d1   : > { %1005 = dma.vmem_to_hbm [thread:$0]  (%p1281_p3), %s793_s25, 128, %s790_s22, %s779_s19  }
 0x5d2 PF: > { %s1449_s12 = sld [smem:[#allocation11_spill]] }
 0x5d3   : > { %s1450_s16 = sld [smem:[#allocation7_spill]] }
 0x5d8   : > { %p1011_p5 = scmp.ge.s32.totalorder %s1449_s12, 2 }
 0x5d9   : > { %s804_s27 = sand.u32 1, %s1450_s16  }
 0x5da   : > { %p1008_p6 = pnand %p1011_p5, %p1291_p9  ;;  %s805_s11 = scalar_lea.sflag [#allocation5], %s804_s27 }
 0x5dc   : > { %p1009_p7 = pneg %p1008_p6 }
 0x5de   : > { %1149 = dma.done.wait (%p1009_p7), %s805_s11, 128  }
 0x5df   : > { %1151 = vsyncadd (%p1009_p7), %s805_s11, 4294967168  ;;  %s21_s12 = sadd.s32 1, %s1449_s12   ;;  %s1452_s21 = sld [smem:[#allocation8_spill]] }
 0x5e0   : > { %p18_p8 = scmp.ge.s32.totalorder %s21_s12, 10   ;;  %s1453_s29 = sld [smem:[#allocation15_spill]] }
 0x5e1   : > { %s1454_s30 = sld [smem:[#allocation9_spill]]  ;;  %s1458_s27 = smov %s1158_s28 }
 0x5e2   : > { %s1455_s9 = sld [smem:[#allocation10_spill]]  ;;  %20 = sbr.rel (!%p18_p8) target bundleno = 5 (0x5), region = 107 }
 0x5e3   : > { %s1456_s10 = sld [smem:[#allocation12_spill]] }
 0x5e4   : > { %s1457_s11 = sld [smem:[#allocation13_spill]] }
 0x5e5   : > { %s1459_s28 = smov %s1452_s21 }
 0x5e7   :  { %810 = vsyncpa [#allocation5], 1 }
 0x5e8   :  { %812 = vsyncpa [#allocation5 + $0x1], 1 }

</bundles_post_ra>
